<compile_context>
chip_gen: v7x
topology: tpu7x:2x2x1
jax: 0.10.0
libtpu: 0.0.40
codegen_flags: <defaults>
</compile_context>

<pallas_src>
import functools
import math

import jax
import jax.numpy as jnp
from jax.experimental import pallas as pl
from jax.experimental.pallas import tpu as pltpu


def _bd_partials_kernel(apply_sigmoid, binary, H, nb, n_valid, ragged,
                        x_ref, t_ref, band_ref, out_ref, vsc_ref):
    """Accumulates the global partial sums for BDLoss.

    x_ref/t_ref are (R, W) slabs of whole images stacked along the sublane axis
    (R = images_per_block * H).  band_ref is a (W, W) tridiagonal matrix used to
    compute the horizontal part of the 3x3 cross conv on the MXU; the vertical
    part comes from sublane-shifted loads of a small VMEM scratch.  out_ref is a
    resident (1, 5, 1, W) block of per-lane partials
      [count_nonzero(Y), count_nonzero(t), sum(score*t), sum(t*t), sum(score^2)]
    zeroed at the first step of each core pass and written to HBM once.
    """
    c = pl.program_id(0)                      # parallel (core) axis
    b = pl.program_id(1)                      # arbitrary (accumulation) axis
    R, W = x_ref.shape

    @pl.when(b == 0)
    def _init():
        out_ref[...] = jnp.zeros(out_ref.shape, out_ref.dtype)

    # Per-image top/bottom boundary masks from a tiny (R, 1) iota.  Every block
    # starts at a multiple of H, so the local row index mod H is the in-image row.
    r_idx = jax.lax.broadcasted_iota(jnp.int32, (R, 1), 0)
    h = jax.lax.rem(r_idx, H)
    top = h == 0
    bot = h == H - 1

    x = x_ref[...].astype(jnp.float32)
    score = jax.nn.sigmoid(x) if apply_sigmoid else x
    t_raw = t_ref[...]
    band = band_ref[...]

    def accumulate(score, t_raw):
        # Horizontal neighbours + centre on the (otherwise idle) MXU:
        # (t @ band)[r, w] = t[r, w-1] + t[r, w] + t[r, w+1]  (zero padded).
        horiz = jnp.dot(t_raw.astype(band.dtype), band,
                        preferred_element_type=jnp.float32)
        t = t_raw.astype(jnp.float32)
        # Vertical neighbours via sublane-shifted loads of a VMEM scratch
        # (aligned store at row 8, reads at rows +-1).  Halo rows are never real
        # data -- the top/bottom masks zero them -- so no scratch init is needed.
        vsc_ref[8:8 + R, :] = t
        up = jnp.where(top, 0.0, vsc_ref[7:7 + R, :])
        down = jnp.where(bot, 0.0, vsc_ref[9:9 + R, :])
        conv = horiz + up + down

        one = jnp.float32(1.0)
        zero = jnp.float32(0.0)
        if binary:
            # t in {0,1}:  count_nonzero(Y) == sum of t where not all 5 taps
            # fire; count_nonzero(t) == sum(t) == sum(t*t) (y_sum from epilogue).
            c_p = jnp.sum(jnp.where(conv < 4.5, t, zero), axis=0, keepdims=True)
            s_p = jnp.sum(t, axis=0, keepdims=True)
        else:
            Y = conv * t
            Y = jnp.where(Y == 5.0, zero, Y)
            c_p = jnp.sum(jnp.where(Y != zero, one, zero), axis=0, keepdims=True)
            s_p = jnp.sum(jnp.where(t != zero, one, zero), axis=0, keepdims=True)
            out_ref[0, 3] += jnp.sum(t * t, axis=0, keepdims=True)
        i_p = jnp.sum(score * t, axis=0, keepdims=True)
        z_p = jnp.sum(score * score, axis=0, keepdims=True)

        out_ref[0, 0] += c_p
        out_ref[0, 1] += s_p
        out_ref[0, 2] += i_p
        out_ref[0, 4] += z_p

    if ragged:
        # Blocks may overhang the real batch (no padded HBM copies are made).
        # Only those blocks pay for the valid-row masking.
        nvalid = n_valid - (c * nb + b) * R

        @pl.when(nvalid >= R)
        def _full():
            accumulate(score, t_raw)

        @pl.when(nvalid < R)
        def _tail():
            rmask = r_idx < nvalid
            accumulate(jnp.where(rmask, score, 0.0),
                       jnp.where(rmask, t_raw, jnp.zeros_like(t_raw)))
    else:
        accumulate(score, t_raw)


def _num_tensorcores():
    """Best-effort TensorCores per chip (v7x: 2; v5e/v6e: 1)."""
    try:
        dev = jax.devices()[0]
        for attr in ("num_cores", "core_count", "num_cores_per_chip"):
            val = getattr(dev, attr, None)
            if isinstance(val, int) and val >= 1:
                return min(val, 2)
    except Exception:
        pass
    return 1


def bd_loss(inputs, target, sigmoid=True, *, target_is_binary=True,
            splits=None, block_rows=None, vmem_budget_bytes=40 * 2**20):
    """BDLoss forward.  inputs/target: (B, H, W) float.  Returns a scalar.

    target_is_binary=True enables the exact {0,1}-target simplifications
    (count_nonzero(t)==sum(t)==sum(t*t); bf16 MXU conv); pass False for soft
    labels.  Logits/targets stream in their incoming dtype (f32 or bf16); all
    arithmetic is float32 inside the kernel.
    """
    assert inputs.shape == target.shape, (
        f"predict {inputs.shape} & target {target.shape} shape do not match")
    assert inputs.ndim == 3, "expected (batch, height, width) tensors"
    B, H, W = inputs.shape

    def _as_kernel_dtype(a):
        if a.dtype in (jnp.float32, jnp.bfloat16):
            return a
        return a.astype(jnp.float32)

    x = _as_kernel_dtype(inputs).reshape(B * H, W)
    t = _as_kernel_dtype(target).reshape(B * H, W)
    xsz = x.dtype.itemsize
    tsz = t.dtype.itemsize

    # Tridiagonal (W, W) band for the horizontal conv; bf16 is exact for binary
    # targets (and for bf16-stored targets), otherwise keep f32.
    dot_dtype = (jnp.bfloat16
                 if (target_is_binary or t.dtype == jnp.bfloat16)
                 else jnp.float32)
    bsz = 2 if dot_dtype == jnp.bfloat16 else 4
    idx = jnp.arange(W, dtype=jnp.int32)
    band = (jnp.abs(idx[:, None] - idx[None, :]) <= 1).astype(dot_dtype)

    if splits is None:
        splits = _num_tensorcores()
    splits = max(1, min(int(splits), B))

    # ---- block sizing: whole images per block, sublane-aligned row count ----
    needs16 = (xsz == 2) or (tsz == 2)
    m = (16 // math.gcd(H, 16)) if needs16 else (8 // math.gcd(H, 8))
    w_pad = -(-W // 128) * 128
    bb_cap = -(-B // splits)
    bb_cap = -(-bb_cap // m) * m
    if block_rows is not None:
        bb = max(m, min(bb_cap, (int(block_rows) // H) // m * m))
    else:
        per_row = w_pad * (2 * (xsz + tsz) + 4)      # 2x-buffered x,t + scratch
        fixed = 2 * w_pad * w_pad * bsz + 16 * w_pad * 4 + 2 * 5 * 8 * w_pad * 4
        rows_budget = max(H * m, (int(vmem_budget_bytes) - fixed) // per_row)
        bb = max(m, min(bb_cap, (rows_budget // H) // m * m))
    R = bb * H
    # TODO(synk): single images whose rows alone exceed the VMEM budget (e.g.
    # >~2048^2 f32) would need intra-image spatial tiling with a halo.

    needed = -(-B // bb)                     # row-blocks containing real data
    splits = max(1, min(splits, needed))
    nb = -(-needed // splits)                # blocks per core
    n_valid = B * H
    ragged = (splits * nb * R) != n_valid
    last_blk = needed - 1

    resident = (2 * R * w_pad * (xsz + tsz) + (R + 16) * w_pad * 4
                + 2 * w_pad * w_pad * bsz + 2 * 5 * 8 * w_pad * 4)
    vmem_limit = int(min(100 * 2**20, max(32 * 2**20, resident + 16 * 2**20)))

    kernel = functools.partial(_bd_partials_kernel, bool(sigmoid),
                               bool(target_is_binary), H, nb, n_valid,
                               bool(ragged))

    n_elem = B * H * W
    cost = pl.CostEstimate(
        flops=int(n_elem) * (16 + 2 * W),
        transcendentals=int(n_elem) if sigmoid else 0,
        bytes_accessed=int(n_elem) * (xsz + tsz) + int(band.size) * bsz
        + splits * 5 * W * 4)

    def img_map(c, b, nb=nb, last=last_blk):
        # Clamp so over-covering grid steps never issue a fully out-of-bounds
        # DMA; the kernel masks their contribution to zero.
        return (jnp.minimum(c * nb + b, last), 0)

    out = pl.pallas_call(
        kernel,
        out_shape=jax.ShapeDtypeStruct((splits, 5, 1, W), jnp.float32),
        grid=(splits, nb),
        in_specs=[
            pl.BlockSpec((R, W), img_map),               # logits (f32 or bf16)
            pl.BlockSpec((R, W), img_map),               # target (f32 or bf16)
            pl.BlockSpec((W, W), lambda c, b: (0, 0)),   # band (resident)
        ],
        out_specs=pl.BlockSpec((1, 5, 1, W), lambda c, b: (c, 0, 0, 0)),
        scratch_shapes=[pltpu.VMEM((R + 16, W), jnp.float32)],
        compiler_params=pltpu.CompilerParams(
            dimension_semantics=("parallel", "arbitrary"),
            vmem_limit_bytes=vmem_limit),
        cost_estimate=cost,
    )(x, t, band)

    # Tiny epilogue in plain JAX: final lane reduce + scalar algebra.
    sums = jnp.sum(out, axis=(0, 2, 3))                  # (5,)
    C, S, intersect = sums[0], sums[1], sums[2]
    z_sum = sums[4]
    y_sum = S if target_is_binary else sums[3]

    smooth = 1e-5
    alpha = 1.0 - (C + smooth) / (S + smooth)
    alpha = 2.0 * alpha - 1.0
    alpha = jnp.minimum(alpha, 0.8)
    return (z_sum + y_sum - 2.0 * intersect + smooth) / (
        z_sum + y_sum - (1.0 + alpha) * intersect + smooth)


def bd_loss_ref(inputs, target, sigmoid=True):
    """Pure-JAX reference mirroring the PyTorch module (for verification)."""
    x = inputs.astype(jnp.float32)
    target = target.astype(jnp.float32)
    score = jax.nn.sigmoid(x) if sigmoid else x
    k = jnp.array([[0, 1, 0], [1, 1, 1], [0, 1, 0]], jnp.float32)
    conv = jax.lax.conv_general_dilated(
        target[:, None, :, :], k[None, None, :, :],
        window_strides=(1, 1), padding=((1, 1), (1, 1)),
        dimension_numbers=("NCHW", "OIHW", "NCHW"))[:, 0]
    Y = conv * target
    Y = jnp.where(Y == 5.0, 0.0, Y)
    C = jnp.count_nonzero(Y).astype(jnp.float32)
    S = jnp.count_nonzero(target).astype(jnp.float32)
    smooth = 1e-5
    alpha = 1.0 - (C + smooth) / (S + smooth)
    alpha = 2.0 * alpha - 1.0
    alpha = jnp.minimum(alpha, 0.8)
    intersect = jnp.sum(score * target)
    y_sum = jnp.sum(target * target)
    z_sum = jnp.sum(score * score)
    return (z_sum + y_sum - 2.0 * intersect + smooth) / (
        z_sum + y_sum - (1.0 + alpha) * intersect + smooth)


if __name__ == "__main__":
    key = jax.random.PRNGKey(0)

    def make(k, B, H, W, soft=False):
        k1, k2 = jax.random.split(k)
        logits = jax.random.normal(k1, (B, H, W), jnp.float32)
        u = jax.random.uniform(k2, (B, H, W), jnp.float32)
        tgt = u if soft else (u > 0.5).astype(jnp.float32)
        return logits, tgt

    k1, k2, k3, k4 = jax.random.split(key, 4)

    # 1) small, fully aligned blocks, sigmoid on and off.
    x1, t1 = make(k1, 2, 16, 16)
    for sg in (True, False):
        got = jax.block_until_ready(bd_loss(x1, t1, sigmoid=sg))
        ref = bd_loss_ref(x1, t1, sigmoid=sg)
        assert jnp.allclose(got, ref, rtol=1e-4, atol=1e-5), (sg, got, ref)

    # 2) two parallel splits, one image per block, one redundant (clamped)
    #    grid step whose contribution must be masked to zero.
    x2, t2 = make(k2, 3, 24, 40)
    got = jax.block_until_ready(bd_loss(x2, t2, splits=2, block_rows=24))
    ref = bd_loss_ref(x2, t2)
    assert jnp.allclose(got, ref, rtol=1e-4, atol=1e-5), (got, ref)

    # 3) multi-step accumulation on one core, two images per block (interior
    #    image-boundary masks) and a partially out-of-bounds last block;
    #    also bf16 logits / bf16 targets ingest on the same data.
    x3, t3 = make(k3, 3, 8, 24)
    got = jax.block_until_ready(bd_loss(x3, t3, splits=1, block_rows=16))
    ref = bd_loss_ref(x3, t3)
    assert jnp.allclose(got, ref, rtol=1e-4, atol=1e-5), (got, ref)

    got_bf = jax.block_until_ready(
        bd_loss(x3.astype(jnp.bfloat16), t3.astype(jnp.bfloat16),
                splits=1, block_rows=16))
    ref_bf = bd_loss_ref(x3.astype(jnp.bfloat16), t3)
    assert jnp.allclose(got_bf, ref_bf, rtol=1e-3, atol=1e-4), (got_bf, ref_bf)

    # 4) soft (non-binary) targets through the general path.
    x4, t4 = make(k4, 2, 16, 32, soft=True)
    got = jax.block_until_ready(bd_loss(x4, t4, target_is_binary=False))
    ref = bd_loss_ref(x4, t4)
    assert jnp.allclose(got, ref, rtol=1e-4, atol=1e-5), (got, ref)

    print("KERNEL_OK")
</pallas_src>

<mosaic_0001>
module attributes {stable_mosaic.version = 11 : i64} {
  func.func @_bd_partials_kernel(%arg0: i32, %arg1: i32, %arg2: memref<32x16xf32, #tpu.memory_space<vmem>>, %arg3: memref<32x16xf32, #tpu.memory_space<vmem>>, %arg4: memref<16x16xbf16, #tpu.memory_space<vmem>>, %arg5: memref<1x5x1x16xf32, #tpu.memory_space<vmem>>, %arg6: memref<48x16xf32, #tpu.memory_space<vmem>>) attributes {dimension_semantics = [#tpu.dimension_semantics<parallel>, #tpu.dimension_semantics<arbitrary>], iteration_bounds = array<i64: 1, 1>, scalar_prefetch = 0 : i64, scratch_operands = 1 : i64, tpu.core_type = #tpu.core_type<tc>, window_params = [{transform_indices = @transform_0, window_bounds = array<i64: 32, 16>}, {transform_indices = @transform_1, window_bounds = array<i64: 32, 16>}, {pipeline_mode = #tpu.pipeline_mode<synchronous>, transform_indices = @transform_2, window_bounds = array<i64: 16, 16>}, {transform_indices = @transform_3, window_bounds = array<i64: 1, 5, 1, 16>}]} {
    %c0_i32 = arith.constant 0 : i32
    %0 = arith.cmpi eq, %arg1, %c0_i32 : i32
    %1 = arith.extui %0 : i1 to i32
    %c0_i32_0 = arith.constant 0 : i32
    %2 = arith.cmpi ne, %1, %c0_i32_0 : i32
    scf.if %2 {
      %cst_48 = arith.constant 0.000000e+00 : f32
      %71 = vector.broadcast %cst_48 : f32 to vector<1x5x1x16xf32>
      %c0_49 = arith.constant 0 : index
      %c0_50 = arith.constant 0 : index
      %c0_51 = arith.constant 0 : index
      %c0_52 = arith.constant 0 : index
      %72 = vector.load %arg5[%c0_49, %c0_50, %c0_51, %c0_52] : memref<1x5x1x16xf32, #tpu.memory_space<vmem>>, vector<1x5x1x16xf32>
      tpu.vector_store %arg5[%c0_49, %c0_50, %c0_51, %c0_52], %71 {strides = array<i32>} : memref<1x5x1x16xf32, #tpu.memory_space<vmem>>, vector<1x5x1x16xf32>,
    } else {
    }
    %3 = tpu.iota {dimensions = array<i32: 0>} : vector<32x1xi32>
    %c16_i32 = arith.constant 16 : i32
    %4 = vector.broadcast %c16_i32 : i32 to vector<32x1xi32>
    %5 = arith.remsi %3, %4 : vector<32x1xi32>
    %c0_i32_1 = arith.constant 0 : i32
    %6 = vector.broadcast %c0_i32_1 : i32 to vector<32x1xi32>
    %7 = arith.cmpi eq, %5, %6 : vector<32x1xi32>
    %c15_i32 = arith.constant 15 : i32
    %8 = vector.broadcast %c15_i32 : i32 to vector<32x1xi32>
    %9 = arith.cmpi eq, %5, %8 : vector<32x1xi32>
    %c0 = arith.constant 0 : index
    %c0_2 = arith.constant 0 : index
    %10 = vector.load %arg2[%c0, %c0_2] : memref<32x16xf32, #tpu.memory_space<vmem>>, vector<32x16xf32>
    %11 = arith.negf %10 : vector<32x16xf32>
    %12 = math.exp %11 : vector<32x16xf32>
    %cst = arith.constant 1.000000e+00 : f32
    %13 = vector.broadcast %cst : f32 to vector<32x16xf32>
    %14 = arith.addf %13, %12 : vector<32x16xf32>
    %15 = arith.divf %13, %14 : vector<32x16xf32>
    %c0_3 = arith.constant 0 : index
    %c0_4 = arith.constant 0 : index
    %16 = vector.load %arg3[%c0_3, %c0_4] : memref<32x16xf32, #tpu.memory_space<vmem>>, vector<32x16xf32>
    %c0_5 = arith.constant 0 : index
    %c0_6 = arith.constant 0 : index
    %17 = vector.load %arg4[%c0_5, %c0_6] : memref<16x16xbf16, #tpu.memory_space<vmem>>, vector<16x16xbf16>
    %18 = arith.truncf %16 : vector<32x16xf32> to vector<32x16xbf16>
    %cst_7 = arith.constant dense<0.000000e+00> : vector<32x16xf32>
    %19 = tpu.matmul %18, %17, %cst_7 {dimension_numbers = #tpu.dot_dimension_numbers<[1], [0], [0], [1], [0, 0, 1, 1], [], []>} : vector<32x16xbf16>, vector<16x16xbf16>, vector<32x16xf32> -> vector<32x16xf32>
    %c8 = arith.constant 8 : index
    %c0_8 = arith.constant 0 : index
    %20 = vector.load %arg6[%c8, %c0_8] : memref<48x16xf32, #tpu.memory_space<vmem>>, vector<32x16xf32>
    tpu.vector_store %arg6[%c8, %c0_8], %16 {strides = array<i32>} : memref<48x16xf32, #tpu.memory_space<vmem>>, vector<32x16xf32>,
    %c7 = arith.constant 7 : index
    %c0_9 = arith.constant 0 : index
    %21 = vector.load %arg6[%c7, %c0_9] : memref<48x16xf32, #tpu.memory_space<vmem>>, vector<32x16xf32>
    %cst_10 = arith.constant 0.000000e+00 : f32
    %22 = vector.shape_cast %7 : vector<32x1xi1> to vector<32x1xi1>
    %23 = vector.broadcast %22 : vector<32x1xi1> to vector<32x16xi1>
    %24 = vector.broadcast %cst_10 : f32 to vector<32x16xf32>
    %25 = arith.select %23, %24, %21 : vector<32x16xi1>, vector<32x16xf32>
    %c9 = arith.constant 9 : index
    %c0_11 = arith.constant 0 : index
    %26 = vector.load %arg6[%c9, %c0_11] : memref<48x16xf32, #tpu.memory_space<vmem>>, vector<32x16xf32>
    %cst_12 = arith.constant 0.000000e+00 : f32
    %27 = vector.shape_cast %9 : vector<32x1xi1> to vector<32x1xi1>
    %28 = vector.broadcast %27 : vector<32x1xi1> to vector<32x16xi1>
    %29 = vector.broadcast %cst_12 : f32 to vector<32x16xf32>
    %30 = arith.select %28, %29, %26 : vector<32x16xi1>, vector<32x16xf32>
    %31 = arith.addf %19, %25 : vector<32x16xf32>
    %32 = arith.addf %31, %30 : vector<32x16xf32>
    %cst_13 = arith.constant 4.500000e+00 : f32
    %33 = vector.broadcast %cst_13 : f32 to vector<32x16xf32>
    %34 = arith.cmpf olt, %32, %33 : vector<32x16xf32>
    %cst_14 = arith.constant 0.000000e+00 : f32
    %35 = vector.broadcast %cst_14 : f32 to vector<32x16xf32>
    %36 = arith.select %34, %16, %35 : vector<32x16xi1>, vector<32x16xf32>
    %cst_15 = arith.constant dense<0.000000e+00> : vector<16xf32>
    %37 = vector.multi_reduction <add>, %36, %cst_15 [0] : vector<32x16xf32> to vector<16xf32>
    %38 = vector.shape_cast %37 : vector<16xf32> to vector<1x16xf32>
    %cst_16 = arith.constant dense<0.000000e+00> : vector<16xf32>
    %39 = vector.multi_reduction <add>, %16, %cst_16 [0] : vector<32x16xf32> to vector<16xf32>
    %40 = vector.shape_cast %39 : vector<16xf32> to vector<1x16xf32>
    %41 = arith.mulf %15, %16 : vector<32x16xf32>
    %cst_17 = arith.constant dense<0.000000e+00> : vector<16xf32>
    %42 = vector.multi_reduction <add>, %41, %cst_17 [0] : vector<32x16xf32> to vector<16xf32>
    %43 = vector.shape_cast %42 : vector<16xf32> to vector<1x16xf32>
    %44 = arith.mulf %15, %15 : vector<32x16xf32>
    %cst_18 = arith.constant dense<0.000000e+00> : vector<16xf32>
    %45 = vector.multi_reduction <add>, %44, %cst_18 [0] : vector<32x16xf32> to vector<16xf32>
    %46 = vector.shape_cast %45 : vector<16xf32> to vector<1x16xf32>
    %c0_19 = arith.constant 0 : index
    %c0_20 = arith.constant 0 : index
    %c0_21 = arith.constant 0 : index
    %c0_22 = arith.constant 0 : index
    %47 = vector.load %arg5[%c0_19, %c0_20, %c0_21, %c0_22] : memref<1x5x1x16xf32, #tpu.memory_space<vmem>>, vector<1x1x1x16xf32>
    %48 = vector.shape_cast %47 : vector<1x1x1x16xf32> to vector<1x16xf32>
    %49 = arith.addf %48, %38 : vector<1x16xf32>
    %c0_23 = arith.constant 0 : index
    %c0_24 = arith.constant 0 : index
    %c0_25 = arith.constant 0 : index
    %c0_26 = arith.constant 0 : index
    %50 = vector.load %arg5[%c0_23, %c0_24, %c0_25, %c0_26] : memref<1x5x1x16xf32, #tpu.memory_space<vmem>>, vector<1x1x1x16xf32>
    %51 = vector.shape_cast %50 : vector<1x1x1x16xf32> to vector<1x16xf32>
    %52 = vector.shape_cast %49 : vector<1x16xf32> to vector<1x1x1x16xf32>
    tpu.vector_store %arg5[%c0_23, %c0_24, %c0_25, %c0_26], %52 {strides = array<i32>} : memref<1x5x1x16xf32, #tpu.memory_space<vmem>>, vector<1x1x1x16xf32>,
    %c0_27 = arith.constant 0 : index
    %c1 = arith.constant 1 : index
    %c0_28 = arith.constant 0 : index
    %c0_29 = arith.constant 0 : index
    %53 = vector.load %arg5[%c0_27, %c1, %c0_28, %c0_29] : memref<1x5x1x16xf32, #tpu.memory_space<vmem>>, vector<1x1x1x16xf32>
    %54 = vector.shape_cast %53 : vector<1x1x1x16xf32> to vector<1x16xf32>
    %55 = arith.addf %54, %40 : vector<1x16xf32>
    %c0_30 = arith.constant 0 : index
    %c1_31 = arith.constant 1 : index
    %c0_32 = arith.constant 0 : index
    %c0_33 = arith.constant 0 : index
    %56 = vector.load %arg5[%c0_30, %c1_31, %c0_32, %c0_33] : memref<1x5x1x16xf32, #tpu.memory_space<vmem>>, vector<1x1x1x16xf32>
    %57 = vector.shape_cast %56 : vector<1x1x1x16xf32> to vector<1x16xf32>
    %58 = vector.shape_cast %55 : vector<1x16xf32> to vector<1x1x1x16xf32>
    tpu.vector_store %arg5[%c0_30, %c1_31, %c0_32, %c0_33], %58 {strides = array<i32>} : memref<1x5x1x16xf32, #tpu.memory_space<vmem>>, vector<1x1x1x16xf32>,
    %c0_34 = arith.constant 0 : index
    %c2 = arith.constant 2 : index
    %c0_35 = arith.constant 0 : index
    %c0_36 = arith.constant 0 : index
    %59 = vector.load %arg5[%c0_34, %c2, %c0_35, %c0_36] : memref<1x5x1x16xf32, #tpu.memory_space<vmem>>, vector<1x1x1x16xf32>
    %60 = vector.shape_cast %59 : vector<1x1x1x16xf32> to vector<1x16xf32>
    %61 = arith.addf %60, %43 : vector<1x16xf32>
    %c0_37 = arith.constant 0 : index
    %c2_38 = arith.constant 2 : index
    %c0_39 = arith.constant 0 : index
    %c0_40 = arith.constant 0 : index
    %62 = vector.load %arg5[%c0_37, %c2_38, %c0_39, %c0_40] : memref<1x5x1x16xf32, #tpu.memory_space<vmem>>, vector<1x1x1x16xf32>
    %63 = vector.shape_cast %62 : vector<1x1x1x16xf32> to vector<1x16xf32>
    %64 = vector.shape_cast %61 : vector<1x16xf32> to vector<1x1x1x16xf32>
    tpu.vector_store %arg5[%c0_37, %c2_38, %c0_39, %c0_40], %64 {strides = array<i32>} : memref<1x5x1x16xf32, #tpu.memory_space<vmem>>, vector<1x1x1x16xf32>,
    %c0_41 = arith.constant 0 : index
    %c4 = arith.constant 4 : index
    %c0_42 = arith.constant 0 : index
    %c0_43 = arith.constant 0 : index
    %65 = vector.load %arg5[%c0_41, %c4, %c0_42, %c0_43] : memref<1x5x1x16xf32, #tpu.memory_space<vmem>>, vector<1x1x1x16xf32>
    %66 = vector.shape_cast %65 : vector<1x1x1x16xf32> to vector<1x16xf32>
    %67 = arith.addf %66, %46 : vector<1x16xf32>
    %c0_44 = arith.constant 0 : index
    %c4_45 = arith.constant 4 : index
    %c0_46 = arith.constant 0 : index
    %c0_47 = arith.constant 0 : index
    %68 = vector.load %arg5[%c0_44, %c4_45, %c0_46, %c0_47] : memref<1x5x1x16xf32, #tpu.memory_space<vmem>>, vector<1x1x1x16xf32>
    %69 = vector.shape_cast %68 : vector<1x1x1x16xf32> to vector<1x16xf32>
    %70 = vector.shape_cast %67 : vector<1x16xf32> to vector<1x1x1x16xf32>
    tpu.vector_store %arg5[%c0_44, %c4_45, %c0_46, %c0_47], %70 {strides = array<i32>} : memref<1x5x1x16xf32, #tpu.memory_space<vmem>>, vector<1x1x1x16xf32>,
    return
  }
  func.func @transform_0(%arg0: i32, %arg1: i32) -> (i32, i32) {
    %c1_i32 = arith.constant 1 : i32
    %0 = arith.muli %arg0, %c1_i32 : i32
    %1 = arith.addi %0, %arg1 : i32
    %c0_i32 = arith.constant 0 : i32
    %2 = arith.minsi %1, %c0_i32 : i32
    %c0_i32_0 = arith.constant 0 : i32
    %c0_i32_1 = arith.constant 0 : i32
    return %2, %c0_i32_0 : i32, i32
  }
  func.func @transform_1(%arg0: i32, %arg1: i32) -> (i32, i32) {
    %c1_i32 = arith.constant 1 : i32
    %0 = arith.muli %arg0, %c1_i32 : i32
    %1 = arith.addi %0, %arg1 : i32
    %c0_i32 = arith.constant 0 : i32
    %2 = arith.minsi %1, %c0_i32 : i32
    %c0_i32_0 = arith.constant 0 : i32
    %c0_i32_1 = arith.constant 0 : i32
    return %2, %c0_i32_0 : i32, i32
  }
  func.func @transform_2(%arg0: i32, %arg1: i32) -> (i32, i32) {
    %c0_i32 = arith.constant 0 : i32
    %c0_i32_0 = arith.constant 0 : i32
    %c0_i32_1 = arith.constant 0 : i32
    return %c0_i32, %c0_i32_0 : i32, i32
  }
  func.func @transform_3(%arg0: i32, %arg1: i32) -> (i32, i32, i32, i32) {
    %c0_i32 = arith.constant 0 : i32
    %c0_i32_0 = arith.constant 0 : i32
    %c0_i32_1 = arith.constant 0 : i32
    %c0_i32_2 = arith.constant 0 : i32
    return %arg0, %c0_i32, %c0_i32_0, %c0_i32_1 : i32, i32, i32, i32
  }
}

</mosaic_0001>

<bundles_post_ra>
// kernel: tpu_custom_call.1
= control target key start
LH: loop header
LB: loop body
LE: loop exit
PB: predicated region body
PF: predicated region fallthrough
CT: control target
= control target key end

     0   :  { %vm167_vm0 = vcmask 130048   ;;  %s582_s0 = inlined_call_operand.vmem [shape: f32[32,16], index: 0, kind: input, shape index: {}]   ;;  %s583_s1 = inlined_call_operand.vmem [shape: f32[32,16], index: 1, kind: input, shape index: {}]   ;;  %s584_s2 = inlined_call_operand.vmem [shape: bf16[16,16], index: 2, kind: input, shape index: {}]   ;;  %s585_s3 = inlined_call_operand.hbm [shape: f32[1,5,1,16], index: 3, kind: output, shape index: {}]  }
   0x1   :  { %v401_v0 = vld [vmem:[%s584_s2] sm:$0xff]   ;;  %v477_v2 = vld [vmem:[%s583_s1 + $0x8] sm:$0xff]  ;;  %v488_v4 = vld [vmem:[%s583_s1 + $0x10] sm:$0xff] }
   0x2   :  { %v472_v1 = vld [vmem:[%s583_s1] sm:$0xff]  ;;  %391 = vmatprep.subr.bf16.mxu0 %v401_v0  ;;  %169 = vst.msk [vmem:[#allocation2 + $0x10] sm:$0xff] %vm167_vm0, %v477_v2  ;;  %v493_v5 = vld [vmem:[%s583_s1 + $0x18] sm:$0xff]  ;;  %170 = vst.msk [vmem:[#allocation2 + $0x18] sm:$0xff] %vm167_vm0, %v488_v4 }
   0x3   :  { %168 = vst.msk [vmem:[#allocation2 + $0x8] sm:$0xff] %vm167_vm0, %v472_v1  ;;  %392 = vmatpush3.bf16.msra.mxu0 %v401_v0  ;;  %v165_v3 = vpack.c.bf16 %v477_v2, %v472_v1  ;;  %v166_v6 = vpack.c.bf16 %v493_v5, %v488_v4  ;;  %171 = vst.msk [vmem:[#allocation2 + $0x20] sm:$0xff] %vm167_vm0, %v493_v5 }
   0x5   :  { %393 = vmatprep.mubr.msk.bf16.mxu0 %vm167_vm0, %v165_v3 }
   0x6   :  { %8 = vsyncpa [#allocation4], 0  ;;  %394 = vmatmul.mubr.msk.bf16.vlgmr.msra.gmra.mrb[0].mxu0 %vm167_vm0, %v166_v6  ;;  %v131_v7 = vld [vmem:[%s582_s0] sm:$0xff]  ;;  %v132_v8 = vld [vmem:[%s582_s0 + $0x8] sm:$0xff]  ;;  %v290_v28 = vsel %vm167_vm0, %v472_v1, 0.0  ;;  %v291_v29 = vsel %vm167_vm0, %v477_v2, 0.0 }
   0x7   :  { %v381_v9 = vmul.f32 -1.442695, %v131_v7  ;;  %v382_v10 = vmul.f32 -1.442695, %v132_v8  ;;  %v133_v11 = vld [vmem:[%s582_s0 + $0x10] sm:$0xff]  ;;  %v134_v13 = vld [vmem:[%s582_s0 + $0x18] sm:$0xff]  ;;  %v292_v34 = vadd.f32 %v291_v29, %v290_v28 }
   0x8   :  { %v383_v12 = vmul.f32 -1.442695, %v133_v11  ;;  %v384_v14 = vmul.f32 -1.442695, %v134_v13  ;;  %v293_v35 = vsel %vm167_vm0, %v488_v4, 0.0  ;;  %v295_v40 = vsel %vm167_vm0, %v493_v5, 0.0 }
   0x9   :  { %402 = vpow2.f32 %v381_v9  ;;  %v294_v39 = vadd.f32 %v293_v35, %v292_v34  ;;  %vm84_vm1 = vcmask 122880   ;;  %v442_v49 = vmov 0.0   ;;  %v174_v28 = vld [vmem:[#allocation2 + $0x17] sm:$0xff]  ;;  %s443_s0 = smov [#allocation3]  }
   0xa   :  { %404 = vpow2.f32 %v382_v10  ;;  %85 = vst.msk [vmem:[#allocation3] sm:$0x1] %vm84_vm1, %v442_v49  ;;  %86 = vst.msk [vmem:[#allocation3 + $0x1] sm:$0x1] %vm84_vm1, %v442_v49  ;;  %s358_s28 = sshll.u32 %s443_s0, 4  ;;  %s359_s28 = int_to_ptr.vmem [resolvable:$true] %s358_s28 }
   0xb   :  { %406 = vpow2.f32 %v383_v12  ;;  %v296_v43 = vadd.f32 %v295_v40, %v294_v39  ;;  %87 = vst.msk [vmem:[#allocation3 + $0x2] sm:$0x1] %vm84_vm1, %v442_v49  ;;  %88 = vst.msk [vmem:[#allocation3 + $0x3] sm:$0x1] %vm84_vm1, %v442_v49  ;;  %v175_v39 = vld [vmem:[#allocation2 + $0x1f] sm:$0xff]  ;;  %s418_s29 = scalar_lea.vmem %s359_s28, 80  ;;  %p423_p1 = scmp.lt.s32.totalorder %s359_s28, %s359_s28 }
   0xc   :  { %408 = vpow2.f32 %v384_v14  ;;  %89 = vst.msk [vmem:[#allocation3 + $0x4] sm:$0x1] %vm84_vm1, %v442_v49  ;;  %p419_p0 = scmp.ne.s32.totalorder %s359_s28, %s418_s29  ;;  %s422_s30 = scalar_lea.vmem %s359_s28, 96 }
   0xd   :  { %v297_v47 = vrot.slane %v296_v43, 4  ;;  %p424_p2 = scmp.lt.s32.totalorder %s422_s30, %s418_s29 }
   0xf   :  { %v298_v53 = vadd.f32 %v297_v47, %v296_v43  ;;  %v188_v43 = vld [vmem:[#allocation2 + $0x9] sm:$0xff]  ;;  %p425_p3 = por %p424_p2, %p423_p1 }
  0x11   :  { %v299_v60 = vrot.slane %v298_v53, 2  ;;  %p426_p4 = pnand %p425_p3, %p419_p0 }
  0x13   :  { %v403_v15 = vpop.eup %402  ;;  %v300_v0 = vadd.f32 %v299_v60, %v298_v53 }
  0x14   :  { %v405_v16 = vpop.eup %404  ;;  %v147_v17 = vadd.f32 1.0, %v403_v15  ;;  %v342_v15 = vld [vmem:[#allocation3 + $0x1] sm:$0x1] }
  0x15   :  { %v148_v18 = vadd.f32 1.0, %v405_v16  ;;  %v407_v19 = vpop.eup %406  ;;  %v301_v8 = vrot.slane %v300_v0, 1  ;;  %v346_v16 = vld [vmem:[#allocation3 + $0x2] sm:$0x1] }
  0x16   :  { %410 = vrcp.f32 %v147_v17  ;;  %v149_v20 = vadd.f32 1.0, %v407_v19  ;;  %v409_v21 = vpop.eup %408  ;;  %v350_v17 = vld [vmem:[#allocation3 + $0x4] sm:$0x1] }
  0x17   :  { %412 = vrcp.f32 %v148_v18  ;;  %v150_v22 = vadd.f32 1.0, %v409_v21  ;;  %v302_v12 = vadd.f32 %v301_v8, %v300_v0  ;;  %v90_v21 = vlaneseq }
  0x18   :  { %414 = vrcp.f32 %v149_v20 }
  0x19   :  { %416 = vrcp.f32 %v150_v22  ;;  %v343_v18 = vadd.f32 %v342_v15, %v302_v12  ;;  %v91_v22 = vshrl.u32 %v90_v21, 7 }
  0x1b   :  { %344 = vst.msk [vmem:[#allocation3 + $0x1] sm:$0x1] %vm84_vm1, %v343_v18 }
  0x20   :  { %v411_v23 = vpop.eup %410 }
  0x21   :  { %v413_v24 = vpop.eup %412  ;;  %v303_v25 = vmul.f32 %v411_v23, %v472_v1  ;;  %v320_v45 = vmul.f32 %v411_v23, %v411_v23  ;;  %v93_v23 = vadd.s32 16, %v91_v22 }
  0x22   :  { %v304_v26 = vmul.f32 %v413_v24, %v477_v2  ;;  %v415_v27 = vpop.eup %414  ;;  %v321_v46 = vmul.f32 %v413_v24, %v413_v24 }
  0x23   :  { %v307_v30 = vsel %vm167_vm0, %v303_v25, 0.0  ;;  %v305_v32 = vmul.f32 %v415_v27, %v488_v4  ;;  %v417_v33 = vpop.eup %416  ;;  %v322_v50 = vmul.f32 %v415_v27, %v415_v27  ;;  %v324_v51 = vsel %vm167_vm0, %v320_v45, 0.0  ;;  %v173_v45 = vld [vmem:[#allocation2 + $0xf] sm:$0xff] }
  0x24   :  { %v308_v31 = vsel %vm167_vm0, %v304_v26, 0.0  ;;  %v306_v37 = vmul.f32 %v417_v33, %v493_v5  ;;  %v325_v52 = vsel %vm167_vm0, %v321_v46, 0.0  ;;  %v323_v55 = vmul.f32 %v417_v33, %v417_v33 }
  0x25   :  { %v309_v36 = vadd.f32 %v308_v31, %v307_v30  ;;  %v310_v38 = vsel %vm167_vm0, %v305_v32, 0.0  ;;  %v326_v54 = vadd.f32 %v325_v52, %v324_v51  ;;  %v327_v56 = vsel %vm167_vm0, %v322_v50, 0.0  ;;  %v172_v31 = vld [vmem:[#allocation2 + $0x7] sm:$0xff] }
  0x26   :  { %v312_v42 = vsel %vm167_vm0, %v306_v37, 0.0  ;;  %v329_v59 = vsel %vm167_vm0, %v323_v55, 0.0  ;;  %v113_v24 = vand.u32 15, %v93_v23  ;;  %v94_v25 = vadd.s32 24, %v91_v22  ;;  %v190_v37 = vld [vmem:[#allocation2 + $0x19] sm:$0xff] }
  0x27   :  { %v311_v41 = vadd.f32 %v310_v38, %v309_v36  ;;  %v328_v58 = vadd.f32 %v327_v56, %v326_v54  ;;  %v99_v26 = vand.u32 15, %v91_v22  ;;  %v92_v27 = vadd.s32 8, %v91_v22  ;;  %v191_v36 = vld [vmem:[#allocation2 + $0x21] sm:$0xff] }
  0x28   :  { %vm125_vm2 = vcmp.eq.s32.totalorder %v113_v24, 0  ;;  %v120_v29 = vand.u32 15, %v94_v25 }
  0x29   :  { %v313_v44 = vadd.f32 %v312_v42, %v311_v41  ;;  %v330_v61 = vadd.f32 %v329_v59, %v328_v58  ;;  %vm543_vm3 = vcmp.eq.s32.totalorder %v99_v26, 0  ;;  %v106_v32 = vand.u32 15, %v92_v27  ;;  %v189_v41 = vld [vmem:[#allocation2 + $0x11] sm:$0xff] }
  0x2a   :  { %v186_v33 = vsel %vm125_vm2, 0.0, %v174_v28  ;;  %v184_v34 = vsel %vm543_vm3, 0.0, %v172_v31  ;;  %vm549_vm4 = vcmp.eq.s32.totalorder %v120_v29, 15 }
  0x2b   :  { %v314_v48 = vrot.slane %v313_v44, 4  ;;  %v331_v63 = vrot.slane %v330_v61, 4  ;;  %vm553_vm5 = vcmp.eq.s32.totalorder %v106_v32, 15  ;;  %v203_v47 = vsel %vm549_vm4, 0.0, %v191_v36 }
  0x2c   :  { %v201_v51 = vsel %vm553_vm5, 0.0, %v189_v41 }
  0x2d   :  { %v315_v57 = vadd.f32 %v314_v48, %v313_v44  ;;  %v332_v3 = vadd.f32 %v331_v63, %v330_v61 }
  0x2f   :  { %v316_v62 = vrot.slane %v315_v57, 2  ;;  %v333_v7 = vrot.slane %v332_v3, 2 }
  0x31   :  { %v317_v6 = vadd.f32 %v316_v62, %v315_v57  ;;  %v334_v9 = vadd.f32 %v333_v7, %v332_v3 }
  0x33   :  { %v318_v10 = vrot.slane %v317_v6, 1  ;;  %v335_v11 = vrot.slane %v334_v9, 1 }
  0x35   :  { %v319_v13 = vadd.f32 %v318_v10, %v317_v6  ;;  %v336_v14 = vadd.f32 %v335_v11, %v334_v9 }
  0x37   :  { %v347_v19 = vadd.f32 %v346_v16, %v319_v13  ;;  %v351_v20 = vadd.f32 %v350_v17, %v336_v14 }
  0x39   :  { %348 = vst.msk [vmem:[#allocation3 + $0x2] sm:$0x1] %vm84_vm1, %v347_v19  ;;  %352 = vst.msk [vmem:[#allocation3 + $0x4] sm:$0x1] %vm84_vm1, %v351_v20 }
  0xd9   :  { %v395_v38 = vpop.f32.mrb[0].mxu0 }
  0xda   :  { %v259_v42 = vadd.f32 %v395_v38, %v186_v33  ;;  %v250_v44 = vpop.f32.mrb[1].mxu0 }
  0xdb   :  { %v251_v46 = vadd.f32 %v250_v44, %v184_v34  ;;  %v396_v48 = vpop.f32.mrb[2].mxu0 }
  0xdc   :  { %v267_v49 = vadd.f32 %v259_v42, %v190_v37  ;;  %v262_v50 = vadd.f32 %v396_v48, %v175_v39  ;;  %v253_v52 = vpop.f32.mrb[3].mxu0 }
  0xdd   :  { %v265_v53 = vadd.f32 %v251_v46, %v188_v43  ;;  %v254_v54 = vadd.f32 %v253_v52, %v173_v45 }
  0xde   :  { %v268_v55 = vadd.f32 %v262_v50, %v203_v47  ;;  %vm271_vm6 = vcmp.lt.f32.partialorder %v267_v49, 4.5 }
  0xdf   :  { %vm269_vm7 = vcmp.lt.f32.partialorder %v265_v53, 4.5  ;;  %v266_v56 = vadd.f32 %v254_v54, %v201_v51  ;;  %v275_v58 = vsel %vm271_vm6, %v488_v4, 0.0 }
  0xe0   :  { %v273_v57 = vsel %vm269_vm7, %v472_v1, 0.0  ;;  %vm272_vm8 = vcmp.lt.f32.partialorder %v268_v55, 4.5  ;;  %v280_v0 = vsel %vm167_vm0, %v275_v58, 0.0 }
  0xe1   :  { %vm270_vm9 = vcmp.lt.f32.partialorder %v266_v56, 4.5  ;;  %v277_v60 = vsel %vm167_vm0, %v273_v57, 0.0  ;;  %v276_v62 = vsel %vm272_vm8, %v493_v5, 0.0 }
  0xe2   :  { %v274_v59 = vsel %vm270_vm9, %v477_v2, 0.0  ;;  %v282_v6 = vsel %vm167_vm0, %v276_v62, 0.0  ;;  %v337_v2 = vld [vmem:[#allocation3] sm:$0x1] }
  0xe3   :  { %v278_v61 = vsel %vm167_vm0, %v274_v59, 0.0 }
  0xe4   :  { %v279_v63 = vadd.f32 %v278_v61, %v277_v60 }
  0xe6   :  { %v281_v3 = vadd.f32 %v280_v0, %v279_v63 }
  0xe8   :  { %v283_v7 = vadd.f32 %v282_v6, %v281_v3 }
  0xea   :  { %v284_v1 = vrot.slane %v283_v7, 4 }
  0xec   :  { %v285_v8 = vadd.f32 %v284_v1, %v283_v7 }
  0xee   :  { %v286_v9 = vrot.slane %v285_v8, 2 }
  0xf0   :  { %v287_v10 = vadd.f32 %v286_v9, %v285_v8 }
  0xf2   :  { %v288_v4 = vrot.slane %v287_v10, 1 }
  0xf4   :  { %v289_v11 = vadd.f32 %v288_v4, %v287_v10 }
  0xf6   :  { %v338_v12 = vadd.f32 %v337_v2, %v289_v11 }
  0xf8   :  { %340 = vst.msk [vmem:[#allocation3] sm:$0x1] %vm84_vm1, %v338_v12 }
  0xf9   :  { %429 = shalt.err (!%p426_p4)
}
  0xfa   :  { %s430_s6 = scalar_lea.hbm %s585_s3, 80 }
  0xfb   :  { %p431_p5 = scmp.ne.s32.totalorder %s585_s3, %s430_s6  ;;  %p434_p6 = scmp.lt.u32.totalorder %s430_s6, %s585_s3 }
  0xfd   :  { %p436_p7 = pnand %p434_p6, %p431_p5 }
  0xff   :  { %439 = shalt.err (!%p436_p7)
}
 0x100   :  { %s444_s11 = smov 16   ;;  %s445_s12 = smov 1  }
 0x101   :  { %364 = dma.vmem_to_hbm [thread:$0]  %s359_s28, 80, %s585_s3, [#allocation4], %s444_s11, %s444_s11, %s445_s12  }
 0x102   :  { %440 = dma.done.wait [#allocation4], 80  }
 0x103   :  { %441 = vsyncadd [#allocation4], 4294967216 }
 0x104   :  { %368 = vsyncpa [#allocation4], 1 }

</bundles_post_ra>
